<compile_context>
chip_gen: v6e
topology: v6e:2x2x1
jax: 0.10.0
libtpu: 0.0.40
codegen_flags: <defaults>
</compile_context>

<pallas_src>
import functools

import jax
import jax.numpy as jnp
import numpy as np
from jax.experimental import pallas as pl
from jax.experimental.pallas import tpu as pltpu

MASK_TOKEN_ID = 103          # BERT [MASK]
LAYER_NORM_EPS = 1e-12       # BERT default layer_norm_eps
MAXLEN = 32                  # pad_mask default
OUT_DTYPE = jnp.bfloat16     # dtype of the (B,S,D) embeddings written to HBM


# ---------------------------------------------------------------------------
# plain-JAX glue (padding + synthetic backbone)
# ---------------------------------------------------------------------------
def pad_mask(x, tokid, maxlen=MAXLEN):
    """JAX port of pad_mask: pad along seq dim with `tokid` up to maxlen."""
    if x.shape[1] > maxlen:
        return x
    pad = jnp.full((x.shape[0], maxlen - x.shape[1]), tokid, dtype=x.dtype)
    return jnp.concatenate([x, pad], axis=1)


def synthetic_backbone(input_ids, embedding_table):
    # TODO(synk): the HuggingFace AutoModelForSequenceClassification backbone is
    # not reproducible here; a deterministic bf16 embedding lookup stands in for
    # the encoder's last hidden state.
    return embedding_table[input_ids]          # (B, S, H) bf16


# ---------------------------------------------------------------------------
# Pallas kernels
# ---------------------------------------------------------------------------
def _gelu_exact(x):
    # torch.nn.GELU() default = exact erf formulation
    return 0.5 * x * (1.0 + jax.lax.erf(x * (1.0 / np.sqrt(2.0))))


def proj_kernel(h_ref, wl_ref, bl_ref, out_ref):
    # (TILE_M, H) @ (H, D): bf16 operands on the MXU, f32 accumulation,
    # bias add on the f32 accumulator, bf16 lane-dense store (D % 128 == 0).
    acc = jnp.dot(h_ref[...], wl_ref[...], preferred_element_type=jnp.float32)
    out_ref[...] = (acc + bl_ref[...]).astype(out_ref.dtype)


def cls_head_kernel(h0_ref, wl_ref, bl_ref, wo_ref, bo_ref, cls_ref):
    # CLS head over a (tile_b, H) chunk of CLS hidden states:
    #   proj -> GELU -> LayerNorm -> @ W_out   (LN affine folded into W_out/bias)
    # Elementwise path stays f32 on the VPU; only matmul operands are bf16.
    p = jnp.dot(h0_ref[...], wl_ref[...],
                preferred_element_type=jnp.float32) + bl_ref[...]          # (tb, D)
    x = _gelu_exact(p)
    mean = jnp.mean(x, axis=-1, keepdims=True)
    var = jnp.mean((x - mean) * (x - mean), axis=-1, keepdims=True)
    xn = (x - mean) * jax.lax.rsqrt(var + LAYER_NORM_EPS)
    # gamma/beta were folded into wo/bo by prepare_head_params:
    #   (xn*g + b) @ W == xn @ (diag(g) W) + b @ W
    cls = jnp.dot(xn.astype(wo_ref.dtype), wo_ref[...],
                  preferred_element_type=jnp.float32) + bo_ref[...]
    cls_ref[...] = cls.astype(cls_ref.dtype)


# ---------------------------------------------------------------------------
# tiling helper + one-time weight prep
# ---------------------------------------------------------------------------
def _divisor_tile(n, target):
    """Largest sublane-aligned tile <= target that divides n exactly.

    Falls back to a single full-extent block when n is small or not a
    multiple of 8 (full-dim blocks are always layout-legal), so no input
    padding or output slicing is ever needed.
    """
    if n <= target or n % 8 != 0:
        return n
    t = max(8, (target // 8) * 8)
    while n % t:
        t -= 8
    return t


def prepare_head_params(params):
    """Hoisted one-time weight preparation (bf16 casts + LayerNorm fold).

    Done once outside the per-forward jit path so the forward graph is
    exactly the two pallas_calls (no per-call convert/elementwise XLA ops).
    """
    D = params["w_lin"].shape[1]
    return {
        "w_lin": params["w_lin"].astype(jnp.bfloat16),                    # (H, D)
        "b_lin": params["b_lin"].reshape(1, D).astype(jnp.float32),       # (1, D)
        "w_out": (params["gamma"][:, None] * params["w_out"]
                  ).astype(jnp.bfloat16),                                  # diag(g) @ W
        "b_out": (params["beta"] @ params["w_out"]
                  ).reshape(1, D).astype(jnp.float32),                     # beta @ W
    }


# ---------------------------------------------------------------------------
# head wrapper (two pallas_calls, no pad / slice round-trips)
# ---------------------------------------------------------------------------
@functools.partial(jax.jit, static_argnames=("tile_m", "tile_b"))
def colbert_head(hidden, w_lin_bf, b_lin2, w_out_eff, b_out_eff,
                 *, tile_m=512, tile_b=512):
    B, S, H = hidden.shape
    D = w_lin_bf.shape[1]
    M = B * S

    # ---- main projection: flatten (B,S,H) -> (B*S,H), tile the M axis ------
    tm = _divisor_tile(M, tile_m)          # divides M exactly -> no pad/slice
    grid_m = M // tm
    h_flat = hidden.reshape(M, H).astype(jnp.bfloat16)   # no-op cast (already bf16)

    last_flat = pl.pallas_call(
        proj_kernel,
        out_shape=jax.ShapeDtypeStruct((M, D), OUT_DTYPE),
        grid_spec=pltpu.PrefetchScalarGridSpec(
            num_scalar_prefetch=0,
            grid=(grid_m,),
            in_specs=[
                pl.BlockSpec((tm, H), lambda i: (i, 0)),   # activations
                pl.BlockSpec((H, D), lambda i: (0, 0)),    # W_lin (resident)
                pl.BlockSpec((1, D), lambda i: (0, 0)),    # b_lin (resident)
            ],
            out_specs=pl.BlockSpec((tm, D), lambda i: (i, 0)),
        ),
        compiler_params=pltpu.CompilerParams(
            dimension_semantics=("parallel",)),   # v7x: 2 TCs split the tiles
    )(h_flat, w_lin_bf, b_lin2)
    last = last_flat.reshape(B, S, D)

    # ---- CLS head, fed directly from hidden[:,0,:] (independent of `last`) --
    h0 = hidden[:, 0, :].astype(jnp.bfloat16)             # (B, H)
    tb = _divisor_tile(B, tile_b)
    grid_b = B // tb

    cls = pl.pallas_call(
        cls_head_kernel,
        out_shape=jax.ShapeDtypeStruct((B, D), jnp.float32),
        grid_spec=pltpu.PrefetchScalarGridSpec(
            num_scalar_prefetch=0,
            grid=(grid_b,),
            in_specs=[
                pl.BlockSpec((tb, H), lambda i: (i, 0)),   # CLS hidden chunk
                pl.BlockSpec((H, D), lambda i: (0, 0)),    # W_lin (resident)
                pl.BlockSpec((1, D), lambda i: (0, 0)),    # b_lin (resident)
                pl.BlockSpec((D, D), lambda i: (0, 0)),    # diag(g) @ W_out
                pl.BlockSpec((1, D), lambda i: (0, 0)),    # beta @ W_out
            ],
            out_specs=pl.BlockSpec((tb, D), lambda i: (i, 0)),
        ),
        compiler_params=pltpu.CompilerParams(
            dimension_semantics=("parallel",)),
    )(h0, w_lin_bf, b_lin2, w_out_eff, b_out_eff)
    return last, cls


# ---------------------------------------------------------------------------
# full forward (glue + kernels)
# ---------------------------------------------------------------------------
def colbert_forward(features, params, head_params=None, padding=True,
                    tile_m=512, tile_b=512):
    if head_params is None:
        head_params = prepare_head_params(params)

    input_ids = features["input_ids"]
    attention_mask = features["attention_mask"]
    if padding:
        input_ids = pad_mask(input_ids, MASK_TOKEN_ID)
        attention_mask = pad_mask(attention_mask, 0)

    hidden = synthetic_backbone(input_ids, params["embedding"])   # (B, S, H) bf16

    last, cls = colbert_head(hidden, head_params["w_lin"], head_params["b_lin"],
                             head_params["w_out"], head_params["b_out"],
                             tile_m=tile_m, tile_b=tile_b)

    out = dict(features)
    out["attention_mask"] = attention_mask
    out["all_layer_embeddings"] = (hidden,)
    out["cls"] = cls
    out["last_layer_embeddings"] = last
    return out


if __name__ == "__main__":
    # Small, lane-aligned demo shapes.  NOTE: real BERT sizes are H=D=768
    # (3x256 -> ideal MXU tiling); H=D=128 here only exercises a quarter of
    # the 256x256 MXU tiles, so do not draw perf conclusions from this demo.
    B, SEQ = 4, 8               # raw batch / seq (pad_mask pads seq to 32)
    H = D = 128                 # multiples of 128 (lane-dense)
    VOCAB = 128
    TILE_M = 16                 # M = B*MAXLEN = 128 -> grid_m = 8 (even: both
                                # v7x TCs busy, 4 pipelined steps per TC)

    key = jax.random.PRNGKey(0)
    k1, k2, k3, k4, k5, k6, k7 = jax.random.split(key, 7)

    params = {
        # backbone emits bf16 hidden states (halves HBM read, native MXU operand)
        "embedding": (0.1 * jax.random.normal(k1, (VOCAB, H), jnp.float32)
                      ).astype(jnp.bfloat16),
        "w_lin": 0.05 * jax.random.normal(k2, (H, D), jnp.float32),   # (in, out)
        "b_lin": 0.01 * jax.random.normal(k3, (D,), jnp.float32),
        "gamma": jnp.ones((D,), jnp.float32) + 0.1 * jax.random.normal(k4, (D,)),
        "beta": 0.01 * jax.random.normal(k5, (D,), jnp.float32),
        "w_out": 0.05 * jax.random.normal(k6, (D, D), jnp.float32),   # (in, out), no bias
    }
    head_params = prepare_head_params(params)      # one-time cast + LN fold

    input_ids = jax.random.randint(k7, (B, SEQ), 0, VOCAB, dtype=jnp.int32)
    attention_mask = jnp.ones((B, SEQ), jnp.int32)
    features = {"input_ids": input_ids, "attention_mask": attention_mask}

    out = colbert_forward(features, params, head_params, padding=True,
                          tile_m=TILE_M)
    jax.block_until_ready(out["cls"])
    jax.block_until_ready(out["last_layer_embeddings"])

    # ---- pure-JAX reference (same bf16 operand quantization as the kernels) ----
    ids_p = pad_mask(input_ids, MASK_TOKEN_ID)
    hidden_f = params["embedding"][ids_p].astype(jnp.float32)
    w_lin_f = params["w_lin"].astype(jnp.bfloat16).astype(jnp.float32)
    proj = hidden_f @ w_lin_f + params["b_lin"]
    # CLS head is fed from hidden[:,0,:] directly (no bf16 `last` round-trip).
    x = jax.nn.gelu(proj[:, 0, :], approximate=False)
    mu = x.mean(-1, keepdims=True)
    var = ((x - mu) ** 2).mean(-1, keepdims=True)
    xn = (x - mu) / jnp.sqrt(var + LAYER_NORM_EPS) * params["gamma"] + params["beta"]
    cls_ref = xn @ params["w_out"]

    np.testing.assert_allclose(
        np.asarray(out["last_layer_embeddings"].astype(jnp.float32)),
        np.asarray(proj), rtol=2e-2, atol=2e-3)
    np.testing.assert_allclose(
        np.asarray(out["cls"]), np.asarray(cls_ref), rtol=5e-2, atol=5e-2)

    print("KERNEL_OK")
</pallas_src>

<mosaic_0001>
module attributes {stable_mosaic.version = 11 : i64} {
  func.func @proj_kernel(%arg0: i32, %arg1: memref<16x128xbf16, #tpu.memory_space<vmem>>, %arg2: memref<128x128xbf16, #tpu.memory_space<vmem>>, %arg3: memref<1x128xf32, #tpu.memory_space<vmem>>, %arg4: memref<16x128xbf16, #tpu.memory_space<vmem>>) attributes {dimension_semantics = [#tpu.dimension_semantics<parallel>], iteration_bounds = array<i64: 8>, scalar_prefetch = 0 : i64, scratch_operands = 0 : i64, tpu.core_type = #tpu.core_type<tc>, window_params = [{transform_indices = @transform_0, window_bounds = array<i64: 16, 128>}, {pipeline_mode = #tpu.pipeline_mode<synchronous>, transform_indices = @transform_1, window_bounds = array<i64: 128, 128>}, {pipeline_mode = #tpu.pipeline_mode<synchronous>, transform_indices = @transform_2, window_bounds = array<i64: 1, 128>}, {transform_indices = @transform_3, window_bounds = array<i64: 16, 128>}]} {
    %c0 = arith.constant 0 : index
    %c0_0 = arith.constant 0 : index
    %0 = vector.load %arg1[%c0, %c0_0] : memref<16x128xbf16, #tpu.memory_space<vmem>>, vector<16x128xbf16>
    %c0_1 = arith.constant 0 : index
    %c0_2 = arith.constant 0 : index
    %1 = vector.load %arg2[%c0_1, %c0_2] : memref<128x128xbf16, #tpu.memory_space<vmem>>, vector<128x128xbf16>
    %cst = arith.constant dense<0.000000e+00> : vector<16x128xf32>
    %2 = tpu.matmul %0, %1, %cst {dimension_numbers = #tpu.dot_dimension_numbers<[1], [0], [0], [1], [0, 0, 1, 1], [], []>} : vector<16x128xbf16>, vector<128x128xbf16>, vector<16x128xf32> -> vector<16x128xf32>
    %c0_3 = arith.constant 0 : index
    %c0_4 = arith.constant 0 : index
    %3 = vector.load %arg3[%c0_3, %c0_4] : memref<1x128xf32, #tpu.memory_space<vmem>>, vector<1x128xf32>
    %4 = vector.broadcast %3 : vector<1x128xf32> to vector<16x128xf32>
    %5 = arith.addf %2, %4 : vector<16x128xf32>
    %6 = arith.truncf %5 : vector<16x128xf32> to vector<16x128xbf16>
    %c0_5 = arith.constant 0 : index
    %c0_6 = arith.constant 0 : index
    %7 = vector.load %arg4[%c0_5, %c0_6] : memref<16x128xbf16, #tpu.memory_space<vmem>>, vector<16x128xbf16>
    tpu.vector_store %arg4[%c0_5, %c0_6], %6 {strides = array<i32>} : memref<16x128xbf16, #tpu.memory_space<vmem>>, vector<16x128xbf16>,
    return
  }
  func.func @transform_0(%arg0: i32) -> (i32, i32) {
    %c0_i32 = arith.constant 0 : i32
    %c0_i32_0 = arith.constant 0 : i32
    return %arg0, %c0_i32 : i32, i32
  }
  func.func @transform_1(%arg0: i32) -> (i32, i32) {
    %c0_i32 = arith.constant 0 : i32
    %c0_i32_0 = arith.constant 0 : i32
    %c0_i32_1 = arith.constant 0 : i32
    return %c0_i32, %c0_i32_0 : i32, i32
  }
  func.func @transform_2(%arg0: i32) -> (i32, i32) {
    %c0_i32 = arith.constant 0 : i32
    %c0_i32_0 = arith.constant 0 : i32
    %c0_i32_1 = arith.constant 0 : i32
    return %c0_i32, %c0_i32_0 : i32, i32
  }
  func.func @transform_3(%arg0: i32) -> (i32, i32) {
    %c0_i32 = arith.constant 0 : i32
    %c0_i32_0 = arith.constant 0 : i32
    return %arg0, %c0_i32 : i32, i32
  }
}

module attributes {stable_mosaic.version = 11 : i64} {
  func.func @cls_head_kernel(%arg0: i32, %arg1: memref<4x128xbf16, #tpu.memory_space<vmem>>, %arg2: memref<128x128xbf16, #tpu.memory_space<vmem>>, %arg3: memref<1x128xf32, #tpu.memory_space<vmem>>, %arg4: memref<128x128xbf16, #tpu.memory_space<vmem>>, %arg5: memref<1x128xf32, #tpu.memory_space<vmem>>, %arg6: memref<4x128xf32, #tpu.memory_space<vmem>>) attributes {dimension_semantics = [#tpu.dimension_semantics<parallel>], iteration_bounds = array<i64: 1>, scalar_prefetch = 0 : i64, scratch_operands = 0 : i64, tpu.core_type = #tpu.core_type<tc>, window_params = [{transform_indices = @transform_0, window_bounds = array<i64: 4, 128>}, {pipeline_mode = #tpu.pipeline_mode<synchronous>, transform_indices = @transform_1, window_bounds = array<i64: 128, 128>}, {pipeline_mode = #tpu.pipeline_mode<synchronous>, transform_indices = @transform_2, window_bounds = array<i64: 1, 128>}, {pipeline_mode = #tpu.pipeline_mode<synchronous>, transform_indices = @transform_3, window_bounds = array<i64: 128, 128>}, {pipeline_mode = #tpu.pipeline_mode<synchronous>, transform_indices = @transform_4, window_bounds = array<i64: 1, 128>}, {transform_indices = @transform_5, window_bounds = array<i64: 4, 128>}]} {
    %c0 = arith.constant 0 : index
    %c0_0 = arith.constant 0 : index
    %0 = vector.load %arg1[%c0, %c0_0] : memref<4x128xbf16, #tpu.memory_space<vmem>>, vector<4x128xbf16>
    %c0_1 = arith.constant 0 : index
    %c0_2 = arith.constant 0 : index
    %1 = vector.load %arg2[%c0_1, %c0_2] : memref<128x128xbf16, #tpu.memory_space<vmem>>, vector<128x128xbf16>
    %cst = arith.constant dense<0.000000e+00> : vector<4x128xf32>
    %2 = tpu.matmul %0, %1, %cst {dimension_numbers = #tpu.dot_dimension_numbers<[1], [0], [0], [1], [0, 0, 1, 1], [], []>} : vector<4x128xbf16>, vector<128x128xbf16>, vector<4x128xf32> -> vector<4x128xf32>
    %c0_3 = arith.constant 0 : index
    %c0_4 = arith.constant 0 : index
    %3 = vector.load %arg3[%c0_3, %c0_4] : memref<1x128xf32, #tpu.memory_space<vmem>>, vector<1x128xf32>
    %4 = vector.broadcast %3 : vector<1x128xf32> to vector<4x128xf32>
    %5 = arith.addf %2, %4 : vector<4x128xf32>
    %cst_5 = arith.constant 5.000000e-01 : f32
    %6 = vector.broadcast %cst_5 : f32 to vector<4x128xf32>
    %7 = arith.mulf %6, %5 : vector<4x128xf32>
    %cst_6 = arith.constant 0.707106769 : f32
    %8 = vector.broadcast %cst_6 : f32 to vector<4x128xf32>
    %9 = arith.mulf %5, %8 : vector<4x128xf32>
    %10 = math.erf %9 : vector<4x128xf32>
    %cst_7 = arith.constant 1.000000e+00 : f32
    %11 = vector.broadcast %cst_7 : f32 to vector<4x128xf32>
    %12 = arith.addf %11, %10 : vector<4x128xf32>
    %13 = arith.mulf %7, %12 : vector<4x128xf32>
    %cst_8 = arith.constant dense<0.000000e+00> : vector<4xf32>
    %14 = vector.multi_reduction <add>, %13, %cst_8 [1] : vector<4x128xf32> to vector<4xf32>
    %15 = vector.shape_cast %14 : vector<4xf32> to vector<4x1xf32>
    %cst_9 = arith.constant 1.280000e+02 : f32
    %16 = vector.broadcast %cst_9 : f32 to vector<4x1xf32>
    %17 = arith.divf %15, %16 : vector<4x1xf32>
    %18 = vector.broadcast %17 : vector<4x1xf32> to vector<4x128xf32>
    %19 = arith.subf %13, %18 : vector<4x128xf32>
    %20 = vector.broadcast %17 : vector<4x1xf32> to vector<4x128xf32>
    %21 = arith.subf %13, %20 : vector<4x128xf32>
    %22 = arith.mulf %19, %21 : vector<4x128xf32>
    %cst_10 = arith.constant dense<0.000000e+00> : vector<4xf32>
    %23 = vector.multi_reduction <add>, %22, %cst_10 [1] : vector<4x128xf32> to vector<4xf32>
    %24 = vector.shape_cast %23 : vector<4xf32> to vector<4x1xf32>
    %cst_11 = arith.constant 1.280000e+02 : f32
    %25 = vector.broadcast %cst_11 : f32 to vector<4x1xf32>
    %26 = arith.divf %24, %25 : vector<4x1xf32>
    %27 = vector.broadcast %17 : vector<4x1xf32> to vector<4x128xf32>
    %28 = arith.subf %13, %27 : vector<4x128xf32>
    %cst_12 = arith.constant 9.99999996E-13 : f32
    %29 = vector.broadcast %cst_12 : f32 to vector<4x1xf32>
    %30 = arith.addf %26, %29 : vector<4x1xf32>
    %31 = math.rsqrt %30 : vector<4x1xf32>
    %32 = vector.broadcast %31 : vector<4x1xf32> to vector<4x128xf32>
    %33 = arith.mulf %28, %32 : vector<4x128xf32>
    %34 = arith.truncf %33 : vector<4x128xf32> to vector<4x128xbf16>
    %c0_13 = arith.constant 0 : index
    %c0_14 = arith.constant 0 : index
    %35 = vector.load %arg4[%c0_13, %c0_14] : memref<128x128xbf16, #tpu.memory_space<vmem>>, vector<128x128xbf16>
    %cst_15 = arith.constant dense<0.000000e+00> : vector<4x128xf32>
    %36 = tpu.matmul %34, %35, %cst_15 {dimension_numbers = #tpu.dot_dimension_numbers<[1], [0], [0], [1], [0, 0, 1, 1], [], []>} : vector<4x128xbf16>, vector<128x128xbf16>, vector<4x128xf32> -> vector<4x128xf32>
    %c0_16 = arith.constant 0 : index
    %c0_17 = arith.constant 0 : index
    %37 = vector.load %arg5[%c0_16, %c0_17] : memref<1x128xf32, #tpu.memory_space<vmem>>, vector<1x128xf32>
    %38 = vector.broadcast %37 : vector<1x128xf32> to vector<4x128xf32>
    %39 = arith.addf %36, %38 : vector<4x128xf32>
    %c0_18 = arith.constant 0 : index
    %c0_19 = arith.constant 0 : index
    %40 = vector.load %arg6[%c0_18, %c0_19] : memref<4x128xf32, #tpu.memory_space<vmem>>, vector<4x128xf32>
    tpu.vector_store %arg6[%c0_18, %c0_19], %39 {strides = array<i32>} : memref<4x128xf32, #tpu.memory_space<vmem>>, vector<4x128xf32>,
    return
  }
  func.func @transform_0(%arg0: i32) -> (i32, i32) {
    %c0_i32 = arith.constant 0 : i32
    %c0_i32_0 = arith.constant 0 : i32
    return %arg0, %c0_i32 : i32, i32
  }
  func.func @transform_1(%arg0: i32) -> (i32, i32) {
    %c0_i32 = arith.constant 0 : i32
    %c0_i32_0 = arith.constant 0 : i32
    %c0_i32_1 = arith.constant 0 : i32
    return %c0_i32, %c0_i32_0 : i32, i32
  }
  func.func @transform_2(%arg0: i32) -> (i32, i32) {
    %c0_i32 = arith.constant 0 : i32
    %c0_i32_0 = arith.constant 0 : i32
    %c0_i32_1 = arith.constant 0 : i32
    return %c0_i32, %c0_i32_0 : i32, i32
  }
  func.func @transform_3(%arg0: i32) -> (i32, i32) {
    %c0_i32 = arith.constant 0 : i32
    %c0_i32_0 = arith.constant 0 : i32
    %c0_i32_1 = arith.constant 0 : i32
    return %c0_i32, %c0_i32_0 : i32, i32
  }
  func.func @transform_4(%arg0: i32) -> (i32, i32) {
    %c0_i32 = arith.constant 0 : i32
    %c0_i32_0 = arith.constant 0 : i32
    %c0_i32_1 = arith.constant 0 : i32
    return %c0_i32, %c0_i32_0 : i32, i32
  }
  func.func @transform_5(%arg0: i32) -> (i32, i32) {
    %c0_i32 = arith.constant 0 : i32
    %c0_i32_0 = arith.constant 0 : i32
    return %arg0, %c0_i32 : i32, i32
  }
}

</mosaic_0001>

<bundles_post_ra>
// kernel: colbert_head.2
= control target key start
LH: loop header
LB: loop body
LE: loop exit
PB: predicated region body
PF: predicated region fallthrough
CT: control target
= control target key end

     0   :  { %8 = vsyncpa [#allocation3], 0  ;;  %s707_s0 = inlined_call_operand.vmem [shape: bf16[128,128], index: 0, kind: input, shape index: {}]   ;;  %s708_s1 = inlined_call_operand.vmem [shape: bf16[128,128], index: 1, kind: input, shape index: {}]   ;;  %s709_s2 = inlined_call_operand.vmem [shape: f32[1,128], index: 2, kind: input, shape index: {}]   ;;  %s710_s3 = inlined_call_operand.hbm [shape: bf16[128,128], index: 3, kind: output, shape index: {}]  }
   0x1   :  { %10 = vsyncpa [#allocation3 + $0x1], 0  ;;  %s579_s12 = smov 0   ;;  %s581_s13 = smov 0  }
   0x2   :  { %s583_s14 = smov 0   ;;  %s585_s15 = smov 0  }
   0x3 LB: > { %s600_s16 = sadd.s32 4294967295, %s552_s15   ;;  %s379_s17 = sadd.s32 4294967294, %s552_s15   ;;  %s552_s15 = sphi %s585_s15, %s716_s15   ;;  %s548_s14 = sphi %s583_s14, %s715_s14   ;;  %s544_s13 = sphi %s581_s13, %s714_s13   ;;  %s540_s12 = sphi %s579_s12, %s713_s12  }
   0x4   : > { %s604_s18 = sadd.s32 1, %s552_s15   ;;  %s91_s19 = sadd.s32 1, %s548_s14 }
   0x5   : > { %s88_s20 = ssub.s32 %s552_s15, %s604_s18  ;;  %p101_p0 = scmp.ne.s32.totalorder %s548_s14, %s544_s13 }
   0x6   : > { %p89_p1 = scmp.eq.s32.totalorder %s88_s20, 0  ;;  %p102_p2 = scmp.eq.s32.totalorder %s600_s16, 7 }
   0x7   : > { %p107_p3 = scmp.ne.s32.totalorder %s544_s13, %s540_s12  ;;  %p108_p4 = scmp.eq.s32.totalorder %s379_s17, 7 }
   0x8   : > { %s615_s21 = scalar_select %p89_p1, %s548_s14, %s91_s19  }
   0x9   : > { %p617_p5 = por %p102_p2, %p101_p0  ;;  %p621_p6 = por %p108_p4, %p107_p3 }
   0xa   : > { %p382_p7 = scmp.ge.s32.totalorder %s552_s15, 1  ;;  %p141_p8 = scmp.lt.s32.totalorder %s552_s15, 9 }
   0xc   : > { %p142_p9 = pnand %p382_p7, %p141_p8 }
   0xd   : > { %s384_s28 = sshll.u32 (!%p142_p9), %s600_s16, 1  ;;  %s162_s27 = sand.u32 (!%p142_p9), 1, %s544_s13  }
   0xe   : > { %145 = sbr.rel (%p142_p9) target bundleno = 267 (0x10b), region = 32  ;;  %p166_p10 = scmp.lt.s32.totalorder (!%p142_p9), %s384_s28, 15 }
   0xf   : > { %s405_s6 = sshll.u32 (!%p142_p9), %s600_s16, 7  ;;  %s667_s10 = scalar_lea.sflag (!%p142_p9), [#allocation3], %s162_s27 }
  0x10   : > { %s665_s9 = scalar_lea.hbm (!%p142_p9), %s710_s3, %s405_s6  ;;  %s556_s16 = smov (!%p142_p9), [#allocation2]  }
  0x11   : > { %s496_s17 = sshll.u32 (!%p142_p9), %s556_s16, 4  ;;  %s497_s17 = int_to_ptr.vmem [resolvable:$false] %s496_s17 }
  0x12   : > { %s498_s19 = scalar_lea.vmem (!%p142_p9), %s497_s17, 256 }
  0x13   : > { %v483_v0 = vld [vmem:[%s708_s1 + $0x38] sm:$0xff]   ;;  %v554_v1 = vmov 0.0   ;;  %v484_v2 = vld [vmem:[%s708_s1 + $0x30] sm:$0xff]   ;;  %vm555_vm0 = vmmov 0   ;;  %s718_s28 = smov (!%p166_p10, %s384_s28), 15  ;;  %v485_v3 = vld [vmem:[%s708_s1 + $0x28] sm:$0xff]  }
  0x14   : > { %420 = vmatprep.subr.bf16.mxu0 %v554_v1  ;;  %436 = vmatprep.mubr.msk.bf16.mxu0 %vm555_vm0, %v554_v1  ;;  %s385_s4 = sshll.u32 %s718_s28, 2  ;;  %v486_v4 = vld [vmem:[%s708_s1 + $0x20] sm:$0xff]   ;;  %v487_v5 = vld [vmem:[%s708_s1 + $0x18] sm:$0xff]   ;;  %v488_v6 = vld [vmem:[%s708_s1 + $0x10] sm:$0xff]   ;;  %s383_s28 = sshll.u32 %s162_s27, 3 }
  0x15   : > { %421 = vmatpush3.bf16.msra.mxu0 %v483_v0  ;;  %s169_s7 = scalar_lea.vmem %s707_s0, %s385_s4  ;;  %v489_v7 = vld [vmem:[%s708_s1 + $0x8] sm:$0xff]   ;;  %v490_v8 = vld [vmem:[%s708_s1] sm:$0xff]   ;;  %s164_s4 = scalar_lea.vmem [#allocation2], %s383_s28 }
  0x16   : > { %422 = vmatprep.subr.bf16.mxu0 %v554_v1  ;;  %v491_v9 = vld [vmem:[%s169_s7] sm:$0xff]   ;;  %s317_s5 = sshll.u32 %s164_s4, 4  ;;  %s660_s5 = int_to_ptr.vmem [resolvable:$true] %s317_s5 }
  0x17   : > { %v386_v11 = vld [vmem:[%s709_s2] ss:$0 sm:$0xff]  ;;  %s492_s11 = scalar_lea.vmem %s660_s5, 128  ;;  %p499_p0 = scmp.lt.s32.totalorder %s660_s5, %s497_s17 }
  0x18   : > { %p493_p11 = scmp.ne.s32.totalorder %s660_s5, %s492_s11  ;;  %p500_p1 = scmp.lt.s32.totalorder %s498_s19, %s492_s11 }
  0x19   : > { %423 = vmatpush3.bf16.msra.mxu0 %v484_v2 }
  0x1a   : > { %424 = vmatprep.subr.bf16.mxu0 %v554_v1  ;;  %p494_p12 = pnand %p493_p11, %p617_p5  ;;  %p501_p2 = por %p500_p1, %p499_p0 }
  0x1c   : > { %p495_p13 = pneg %p494_p12 }
  0x1d   : > { %425 = vmatpush3.bf16.msra.mxu0 %v485_v3 }
  0x1e   : > { %426 = vmatprep.subr.bf16.mxu0 %v554_v1  ;;  %p502_p3 = pnand %p501_p2, %p495_p13 }
  0x21   : > { %427 = vmatpush3.bf16.msra.mxu0 %v486_v4 }
  0x22   : > { %428 = vmatprep.subr.bf16.mxu0 %v554_v1 }
  0x25   : > { %429 = vmatpush3.bf16.msra.mxu0 %v487_v5 }
  0x26   : > { %430 = vmatprep.subr.bf16.mxu0 %v554_v1 }
  0x29   : > { %431 = vmatpush3.bf16.msra.mxu0 %v488_v6 }
  0x2a   : > { %432 = vmatprep.subr.bf16.mxu0 %v554_v1 }
  0x2d   : > { %433 = vmatpush3.bf16.msra.mxu0 %v489_v7 }
  0x2e   : > { %434 = vmatprep.subr.bf16.mxu0 %v554_v1 }
  0x31   : > { %435 = vmatpush3.bf16.msra.mxu0 %v490_v8 }
  0x34   : > { %437 = vmatmul.mubr.bf16.vlgmr.msra.gmra.mxu0 %v491_v9 }
  0xf4   : > { %v286_v10 = vpop.f32.mrf.mxu0 }
  0xf5   : > { %v287_v14 = vadd.f32 %v386_v11, %v286_v10 }
  0xf6   : > { %v438_v12 = vpop.f32.mrf.mxu0 }
  0xf8   : > { %v289_v13 = vpop.f32.mrf.mxu0 }
  0xf9   : > { %v290_v15 = vadd.f32 %v386_v11, %v289_v13 }
  0xfa   : > { %v439_v16 = vpop.f32.mrf.mxu0 }
  0xfb   : > { %v409_v17 = vpack.c.bf16 %v290_v15, %v287_v14 }
  0xfd   : > { %410 = vst [vmem:[%s164_s4] sm:$0xff] %v409_v17  }
  0xfe   : > { %505 = shalt.err (!%p502_p3)
}
  0xff   : > { %s506_s20 = scalar_lea.hbm %s665_s9, 128  ;;  %s510_s26 = scalar_lea.hbm %s710_s3, 1024 }
 0x100   : > { %p507_p4 = scmp.ne.s32.totalorder %s665_s9, %s506_s20  ;;  %p511_p9 = scmp.lt.s32.totalorder %s665_s9, %s710_s3 }
 0x101   : > { %p512_p10 = scmp.lt.s32.totalorder %s510_s26, %s506_s20 }
 0x102   : > { %p508_p7 = pnand %p507_p4, %p617_p5 }
 0x103   : > { %p513_p11 = por %p512_p10, %p511_p9 }
 0x104   : > { %p509_p8 = pneg %p508_p7 }
 0x106   : > { %p514_p12 = pnand %p513_p11, %p509_p8 }
 0x108   : > { %517 = shalt.err (!%p514_p12)
}
 0x109   : > { %s557_s29 = smov 64   ;;  %s558_s30 = smov 4  }
 0x10a   : > { %440 = dma.vmem_to_hbm [thread:$0]  (%p617_p5), %s660_s5, 128, %s665_s9, %s667_s10, %s557_s29, %s557_s29, %s558_s30  }
 0x10b PF: > { %p446_p13 = scmp.ge.s32.totalorder %s552_s15, 2  ;;  %s332_s4 = sand.u32 1, %s540_s12  }
 0x10c   : > { %s333_s6 = scalar_lea.sflag [#allocation3], %s332_s4 }
 0x10d   : > { %p443_p0 = pnand %p446_p13, %p621_p6 }
 0x10f   : > { %p444_p1 = pneg %p443_p0 }
 0x111   : > { %535 = dma.done.wait (%p444_p1), %s333_s6, 128  }
 0x112   : > { %537 = vsyncadd (%p444_p1), %s333_s6, 4294967168  ;;  %p13_p2 = scmp.ge.s32.totalorder %s604_s18, 10   ;;  %s713_s12 = smov %s544_s13 }
 0x113   : > { %s714_s13 = smov %s548_s14  ;;  %s715_s14 = smov %s615_s21 }
 0x114   : > { %s716_s15 = smov %s604_s18  ;;  %15 = sbr.rel (!%p13_p2) target bundleno = 3 (0x3), region = 67 }
 0x119   :  { %338 = vsyncpa [#allocation3], 1 }
 0x11a   :  { %340 = vsyncpa [#allocation3 + $0x1], 1 }

// kernel: colbert_head.3
= control target key start
LH: loop header
LB: loop body
LE: loop exit
PB: predicated region body
PF: predicated region fallthrough
CT: control target
= control target key end

     0   :  { %10 = vsyncpa [#allocation3], 0  ;;  %s555_s0 = inlined_call_operand.vmem [shape: bf16[4,128], index: 0, kind: input, shape index: {}]   ;;  %s556_s1 = inlined_call_operand.hbm [shape: bf16[128,128], index: 1, kind: input, shape index: {}]   ;;  %s557_s2 = inlined_call_operand.vmem [shape: f32[1,128], index: 2, kind: input, shape index: {}]   ;;  %s558_s3 = inlined_call_operand.hbm [shape: bf16[128,128], index: 3, kind: input, shape index: {}]   ;;  %s559_s4 = inlined_call_operand.vmem [shape: f32[1,128], index: 4, kind: input, shape index: {}]   ;;  %s560_s5 = inlined_call_operand.hbm [shape: f32[4,128], index: 5, kind: output, shape index: {}]  }
   0x1   :  { %11 = vsyncpa [#allocation6], 0 }
   0x2   :  { %12 = vsyncpa [#allocation4], 0  ;;  %s480_s18 = smov [#allocation2]  }
   0x3   :  { %s20_s19 = sshll.u32 %s480_s18, 4  ;;  %s21_s19 = int_to_ptr.vmem [resolvable:$true] %s20_s19 }
   0x4   :  { %s422_s20 = scalar_lea.vmem %s21_s19, 1024  ;;  %p427_p1 = scmp.lt.s32.totalorder %s21_s19, %s21_s19 }
   0x5   :  { %p423_p0 = scmp.ne.s32.totalorder %s21_s19, %s422_s20  ;;  %p428_p2 = scmp.lt.s32.totalorder %s422_s20, %s422_s20 }
   0x7   :  { %p429_p3 = por %p428_p2, %p427_p1 }
   0x9   :  { %p430_p4 = pnand %p429_p3, %p423_p0 }
   0xb   :  { %433 = shalt.err (!%p430_p4)
}
   0xc   :  { %s481_s21 = smov 64   ;;  %s482_s22 = smov 4  }
   0xd   :  { %26 = dma.hbm_to_vmem [thread:$0]  %s556_s1, 1024, %s21_s19, [#allocation3], %s481_s21, %s481_s21, %s482_s22  }
   0xe   :  { %s483_s25 = smov [#allocation5]  }
   0xf   :  { %s34_s26 = sshll.u32 %s483_s25, 4  ;;  %s35_s26 = int_to_ptr.vmem [resolvable:$true] %s34_s26 }
  0x10   :  { %s442_s27 = scalar_lea.vmem %s35_s26, 1024  ;;  %p447_p6 = scmp.lt.s32.totalorder %s35_s26, %s35_s26 }
  0x11   :  { %p443_p5 = scmp.ne.s32.totalorder %s35_s26, %s442_s27  ;;  %p448_p7 = scmp.lt.s32.totalorder %s442_s27, %s442_s27 }
  0x13   :  { %p449_p8 = por %p448_p7, %p447_p6 }
  0x15   :  { %p450_p9 = pnand %p449_p8, %p443_p5 }
  0x17   :  { %453 = shalt.err (!%p450_p9)
}
  0x18   :  { %40 = dma.hbm_to_vmem [thread:$0]  %s558_s3, 1024, %s35_s26, [#allocation6], %s481_s21, %s481_s21, %s482_s22  }
  0x19   :  { %474 = dma.done.wait [#allocation3], 1024  }
  0x1a   :  { %475 = vsyncadd [#allocation3], 4294966272 }
  0x1b   :  { %476 = dma.done.wait [#allocation6], 1024  }
  0x1c   :  { %477 = vsyncadd [#allocation6], 4294966272  ;;  %v484_v0 = vmov 0.0   ;;  %vm485_vm0 = vmmov 0   ;;  %v394_v1 = vld [vmem:[#allocation2 + $0x38] sm:$0xff]   ;;  %v395_v2 = vld [vmem:[#allocation2 + $0x30] sm:$0xff]  }
  0x1d   :  { %347 = vmatprep.subr.bf16.mxu0 %v484_v0  ;;  %363 = vmatprep.mubr.msk.bf16.mxu0 %vm485_vm0, %v484_v0  ;;  %v396_v3 = vld [vmem:[#allocation2 + $0x28] sm:$0xff]   ;;  %v397_v4 = vld [vmem:[#allocation2 + $0x20] sm:$0xff]   ;;  %v398_v5 = vld [vmem:[#allocation2 + $0x18] sm:$0xff]   ;;  %vm167_vm1 = vcmask 1043456   ;;  %s486_s7 = smov [#allocation7]  }
  0x1e   :  { %367 = vmatprep.subr.bf16.mxu1 %v484_v0  ;;  %383 = vmatprep.mubr.msk.bf16.mxu1 %vm485_vm0, %v484_v0  ;;  %v399_v6 = vld [vmem:[#allocation2 + $0x10] sm:$0xff]   ;;  %v400_v7 = vld [vmem:[#allocation2 + $0x8] sm:$0xff]   ;;  %v401_v8 = vld [vmem:[#allocation2] sm:$0xff]   ;;  %s301_s8 = sshll.u32 %s486_s7, 4  ;;  %s302_s8 = int_to_ptr.vmem [resolvable:$true] %s301_s8 }
  0x1f   :  { %348 = vmatpush3.bf16.msra.mxu0 %v394_v1  ;;  %v50_v9 = vld [vmem:[%s555_s0] sm:$0x3]  ;;  %v402_v22 = vld [vmem:[#allocation5 + $0x38] sm:$0xff]   ;;  %v403_v23 = vld [vmem:[#allocation5 + $0x30] sm:$0xff]   ;;  %s454_s9 = scalar_lea.vmem %s302_s8, 64  ;;  %p459_p11 = scmp.lt.s32.totalorder %s302_s8, %s302_s8 }
  0x20   :  { %349 = vmatprep.subr.bf16.mxu0 %v484_v0  ;;  %v311_v10 = vld [vmem:[%s557_s2] ss:$0 sm:$0xff]  ;;  %368 = vmatpush3.bf16.msra.mxu1 %v402_v22  ;;  %v404_v24 = vld [vmem:[#allocation5 + $0x28] sm:$0xff]   ;;  %v406_v31 = vld [vmem:[#allocation5 + $0x18] sm:$0xff]   ;;  %p455_p10 = scmp.ne.s32.totalorder %s302_s8, %s454_s9  ;;  %p460_p12 = scmp.lt.s32.totalorder %s454_s9, %s454_s9 }
  0x21   :  { %369 = vmatprep.subr.bf16.mxu1 %v484_v0  ;;  %v405_v30 = vld [vmem:[#allocation5 + $0x20] sm:$0xff]   ;;  %v407_v32 = vld [vmem:[#allocation5 + $0x10] sm:$0xff]   ;;  %v408_v33 = vld [vmem:[#allocation5 + $0x8] sm:$0xff]  }
  0x22   :  { %v409_v34 = vld [vmem:[#allocation5] sm:$0xff]   ;;  %p461_p13 = por %p460_p12, %p459_p11 }
  0x23   :  { %350 = vmatpush3.bf16.msra.mxu0 %v395_v2  ;;  %v320_v41 = vld [vmem:[%s559_s4] ss:$0 sm:$0xff] }
  0x24   :  { %351 = vmatprep.subr.bf16.mxu0 %v484_v0  ;;  %370 = vmatpush3.bf16.msra.mxu1 %v403_v23  ;;  %p462_p0 = pnand %p461_p13, %p455_p10 }
  0x25   :  { %371 = vmatprep.subr.bf16.mxu1 %v484_v0 }
  0x27   :  { %352 = vmatpush3.bf16.msra.mxu0 %v396_v3 }
  0x28   :  { %353 = vmatprep.subr.bf16.mxu0 %v484_v0  ;;  %372 = vmatpush3.bf16.msra.mxu1 %v404_v24 }
  0x29   :  { %373 = vmatprep.subr.bf16.mxu1 %v484_v0 }
  0x2b   :  { %354 = vmatpush3.bf16.msra.mxu0 %v397_v4 }
  0x2c   :  { %355 = vmatprep.subr.bf16.mxu0 %v484_v0  ;;  %374 = vmatpush3.bf16.msra.mxu1 %v405_v30 }
  0x2d   :  { %375 = vmatprep.subr.bf16.mxu1 %v484_v0 }
  0x2f   :  { %356 = vmatpush3.bf16.msra.mxu0 %v398_v5 }
  0x30   :  { %357 = vmatprep.subr.bf16.mxu0 %v484_v0  ;;  %376 = vmatpush3.bf16.msra.mxu1 %v406_v31 }
  0x31   :  { %377 = vmatprep.subr.bf16.mxu1 %v484_v0 }
  0x33   :  { %358 = vmatpush3.bf16.msra.mxu0 %v399_v6 }
  0x34   :  { %359 = vmatprep.subr.bf16.mxu0 %v484_v0  ;;  %378 = vmatpush3.bf16.msra.mxu1 %v407_v32 }
  0x35   :  { %379 = vmatprep.subr.bf16.mxu1 %v484_v0 }
  0x37   :  { %360 = vmatpush3.bf16.msra.mxu0 %v400_v7 }
  0x38   :  { %361 = vmatprep.subr.bf16.mxu0 %v484_v0  ;;  %380 = vmatpush3.bf16.msra.mxu1 %v408_v33 }
  0x39   :  { %381 = vmatprep.subr.bf16.mxu1 %v484_v0 }
  0x3b   :  { %362 = vmatpush3.bf16.msra.mxu0 %v401_v8 }
  0x3c   :  { %382 = vmatpush3.bf16.msra.mxu1 %v409_v34 }
  0x3e   :  { %364 = vmatmul.mubr.bf16.vlgmr.msra.gmra.mxu0 %v50_v9 }
  0xfe   :  { %v156_v11 = vpop.f32.mrf.mxu0 }
  0xff   :  { %v157_v12 = vadd.f32 %v311_v10, %v156_v11 }
 0x100   :  { %v365_v13 = vpop.f32.mrf.mxu0 }
 0x101   :  { %v163_v14 = vmul.f32 0.70710677, %v157_v12  ;;  %v162_v18 = vmul.f32 0.5, %v157_v12 }
 0x102   :  { %v159_v15 = vpop.f32.mrf.mxu0 }
 0x103   :  { %410 = verf.f32 %v163_v14 }
 0x104   :  { %v366_v16 = vpop.f32.mrf.mxu0 }
 0x110   :  { %v411_v17 = vpop.eup %410 }
 0x111   :  { %v165_v19 = vadd.f32 1.0, %v411_v17 }
 0x113   :  { %v166_v20 = vmul.f32 %v165_v19, %v162_v18 }
 0x115   :  { %v168_v21 = vsel %vm167_vm1, %v166_v20, 0.0 }
 0x116   :  { %169 = vadd.xlane.f32.xlu0 %v168_v21 }
 0x19f   :  { %v170_v25 = vpop.xlane.xlu0 %169 }
 0x1a0   :  { %v172_v26 = vmul.f32 0.0078125, %v170_v25 }
 0x1a2   :  { %v173_v27 = vsub.f32 %v166_v20, %v172_v26 }
 0x1a4   :  { %v174_v28 = vmul.f32 %v173_v27, %v173_v27 }
 0x1a6   :  { %v175_v29 = vsel %vm167_vm1, %v174_v28, 0.0 }
 0x1a7   :  { %176 = vadd.xlane.f32.xlu0 %v175_v29 }
 0x230   :  { %v177_v35 = vpop.xlane.xlu0 %176 }
 0x231   :  { %v178_v36 = vmul.f32 0.0078125, %v177_v35 }
 0x233   :  { %v179_v37 = vadd.f32 1e-12, %v178_v36 }
 0x235   :  { %412 = vrsqrt.f32 %v179_v37 }
 0x242   :  { %v413_v38 = vpop.eup %412 }
 0x243   :  { %v181_v39 = vmul.f32 %v413_v38, %v173_v27 }
 0x245   :  { %v182_v40 = vpack.c.bf16 %v181_v39, %v181_v39 }
 0x247   :  { %384 = vmatmul.mubr.bf16.vlgmr.msra.gmra.mxu1 %v182_v40 }
 0x307   :  { %v288_v42 = vpop.f32.mrf.mxu1 }
 0x308   :  { %v289_v43 = vadd.f32 %v320_v41, %v288_v42 }
 0x309   :  { %v385_v44 = vpop.f32.mrf.mxu1 }
 0x30a   :  { %294 = vst [vmem:[#allocation7] sm:$0xf] %v289_v43 }
 0x30b   :  { %v291_v45 = vpop.f32.mrf.mxu1 }
 0x30c   :  { %465 = shalt.err (!%p462_p0)
}
 0x30d   :  { %304 = dma.vmem_to_hbm [thread:$0]  %s302_s8, 64, %s560_s5, [#allocation4]   ;;  %v386_v46 = vpop.f32.mrf.mxu1 }
 0x30e   :  { %478 = dma.done.wait [#allocation4], 64  }
 0x30f   :  { %479 = vsyncadd [#allocation4], 4294967232 }
 0x310   :  { %308 = vsyncpa [#allocation3], 1 }
 0x311   :  { %309 = vsyncpa [#allocation6], 1 }
 0x312   :  { %310 = vsyncpa [#allocation4], 1 }

</bundles_post_ra>
